<compile_context>
chip_gen: v5e
topology: v5e:2x2
jax: 0.10.0
libtpu: 0.0.40
codegen_flags: <defaults>
</compile_context>

<pallas_src>
import jax
import jax.numpy as jnp
from jax.experimental import pallas as pl
from jax.experimental.pallas import tpu as pltpu

_LANES = 512            # C: lane width of a row, multiple of 128
_MAX_TILE_ROWS = 2048   # TR cap: (2, 2048, 512) f32 block = 8 MiB in, 4 MiB out
_SMALL_BATCH = 2048     # below this, a fused XLA matmul beats kernel dispatch


def _linear_kernel(x_ref, w_ref, b_ref, o_ref):
    # x_ref: (2, TR, C) in VMEM  -- feature-major, batch dense on sublanes+lanes
    # w_ref: (2,) in SMEM, b_ref: (1,) in SMEM -- scalar parameters
    # o_ref: (TR, C) in VMEM     -- dense output block, unmasked full-row stores
    # Two scalar-broadcast VPU FMAs + bias add (no XLU reduce, no MXU).
    o_ref[...] = x_ref[0] * w_ref[0] + x_ref[1] * w_ref[1] + b_ref[0]


def _tile_rows(num_rows, max_tr=_MAX_TILE_ROWS):
    """Pick (rows_per_tile, num_tiles) for a batch of `num_rows` x C elements."""
    # Enough tiles that each tile's rows fit under max_tr; at least 2 tiles when
    # there is enough work so the "parallel" axis shards across both TCs on v7x
    # (harmless serial loop on single-TC v5e/v6e).
    nt = pl.cdiv(num_rows, max_tr)
    if num_rows > 8:
        nt = max(nt, 2)
    tr = ((pl.cdiv(num_rows, nt) + 7) // 8) * 8   # multiple of 8 sublanes
    nt = pl.cdiv(num_rows, tr)
    return tr, nt


def linear_forward(x, weight, bias, *, force_pallas=False):
    """y = x @ weight.T + bias; x: (B, 2) f32, weight: (1, 2), bias: (1,) -> (B, 1)."""
    B, D = x.shape
    assert D == 2 and weight.shape == (1, D) and bias.shape == (1,)

    # Small-batch fast path: fused XLA op, skip kernel dispatch + layout pass.
    if not force_pallas and B < _SMALL_BATCH:
        return x @ weight.T + bias

    C = _LANES
    rows = pl.cdiv(B, C)            # rows of C batch elements each
    tr, nt = _tile_rows(rows)       # rows per tile / number of grid steps
    rows_p = nt * tr
    Bp = rows_p * C

    # Feature-major, dense (2, Rp, C) layout.  This is the only extra HBM pass.
    # TODO(synk): if the caller can keep x feature-major (2, B) upstream, this
    # single transpose pass disappears entirely.
    xp = jnp.pad(x, ((0, Bp - B), (0, 0)))     # (Bp, 2), minimal zero-fill
    x_r = xp.T.reshape(D, rows_p, C)           # one fused XLA transpose/reshape

    out = pl.pallas_call(
        _linear_kernel,
        out_shape=jax.ShapeDtypeStruct((rows_p, C), x.dtype),
        grid=(nt,),
        in_specs=[
            pl.BlockSpec((D, tr, C), lambda i: (0, i, 0)),         # x block (VMEM)
            pl.BlockSpec(memory_space=pltpu.MemorySpace.SMEM),     # weight scalars
            pl.BlockSpec(memory_space=pltpu.MemorySpace.SMEM),     # bias scalar
        ],
        out_specs=pl.BlockSpec((tr, C), lambda i: (i, 0)),
        compiler_params=pltpu.CompilerParams(
            # Independent batch tiles -> megacore sharding on v7x.
            dimension_semantics=("parallel",),
            # Double-buffered blocks: 2*(2*tr*C + tr*C)*4 <= ~24 MiB at max tile;
            # raise the scoped limit (v5e default 16 MiB), stay under v7x's 64 MiB.
            vmem_limit_bytes=48 * 1024 * 1024,
        ),
        cost_estimate=pl.CostEstimate(
            flops=4 * Bp,
            bytes_accessed=4 * (3 * Bp) + 12,
            transcendentals=0,
        ),
    )(x_r, weight.reshape(D), bias)

    # Back to the PyTorch layout (B, 1); padded tail (== bias) is sliced off.
    return out.reshape(Bp)[:B].reshape(B, 1)


if __name__ == "__main__":
    key = jax.random.PRNGKey(0)
    kw, kb, kx1, kx2 = jax.random.split(key, 4)

    # Deterministic parameters (shapes from torch.nn.Linear(2, 1)).
    weight = jax.random.uniform(kw, (1, 2), jnp.float32, minval=-0.5, maxval=0.5)
    bias = jax.random.uniform(kb, (1,), jnp.float32, minval=-0.5, maxval=0.5)

    # 1) Demo-sized batch (the module's natural small shape): exercises both the
    #    XLA fast path and (forced) the Pallas kernel on the same data.
    x_small = jax.random.normal(kx1, (8, 2), jnp.float32)
    y_fast = jax.block_until_ready(linear_forward(x_small, weight, bias))
    y_small = jax.block_until_ready(
        linear_forward(x_small, weight, bias, force_pallas=True))

    # 2) Larger batch: takes the Pallas path naturally (2 grid steps, ragged tail).
    x_big = jax.random.normal(kx2, (5000, 2), jnp.float32)
    y_big = jax.block_until_ready(linear_forward(x_big, weight, bias))

    for xx, yy in ((x_small, y_fast), (x_small, y_small), (x_big, y_big)):
        y_ref = xx @ weight.T + bias
        assert yy.shape == (xx.shape[0], 1)
        assert jnp.allclose(yy, y_ref, atol=1e-5), (yy, y_ref)

    print("KERNEL_OK")
</pallas_src>

<mosaic_0001>
module attributes {stable_mosaic.version = 11 : i64} {
  func.func @_linear_kernel(%arg0: i32, %arg1: memref<2x8x512xf32, #tpu.memory_space<vmem>>, %arg2: memref<2xf32, #tpu.memory_space<smem>>, %arg3: memref<1xf32, #tpu.memory_space<smem>>, %arg4: memref<8x512xf32, #tpu.memory_space<vmem>>) attributes {dimension_semantics = [#tpu.dimension_semantics<parallel>], iteration_bounds = array<i64: 1>, scalar_prefetch = 0 : i64, scratch_operands = 0 : i64, tpu.core_type = #tpu.core_type<tc>, window_params = [{transform_indices = @transform_0, window_bounds = array<i64: 2, 8, 512>}, {transform_indices = @transform_1, window_bounds = array<i64: 2>}, {transform_indices = @transform_2, window_bounds = array<i64: 1>}, {transform_indices = @transform_3, window_bounds = array<i64: 8, 512>}]} {
    %c0 = arith.constant 0 : index
    %c0_0 = arith.constant 0 : index
    %c0_1 = arith.constant 0 : index
    %0 = vector.load %arg1[%c0, %c0_0, %c0_1] : memref<2x8x512xf32, #tpu.memory_space<vmem>>, vector<1x8x512xf32>
    %1 = vector.shape_cast %0 : vector<1x8x512xf32> to vector<8x512xf32>
    %c0_2 = arith.constant 0 : index
    %2 = memref.load %arg2[%c0_2] : memref<2xf32, #tpu.memory_space<smem>>
    %3 = vector.broadcast %2 : f32 to vector<8x512xf32>
    %4 = arith.mulf %1, %3 : vector<8x512xf32>
    %c1 = arith.constant 1 : index
    %c0_3 = arith.constant 0 : index
    %c0_4 = arith.constant 0 : index
    %5 = vector.load %arg1[%c1, %c0_3, %c0_4] : memref<2x8x512xf32, #tpu.memory_space<vmem>>, vector<1x8x512xf32>
    %6 = vector.shape_cast %5 : vector<1x8x512xf32> to vector<8x512xf32>
    %c1_5 = arith.constant 1 : index
    %7 = memref.load %arg2[%c1_5] : memref<2xf32, #tpu.memory_space<smem>>
    %8 = vector.broadcast %7 : f32 to vector<8x512xf32>
    %9 = arith.mulf %6, %8 : vector<8x512xf32>
    %10 = arith.addf %4, %9 : vector<8x512xf32>
    %c0_6 = arith.constant 0 : index
    %11 = memref.load %arg3[%c0_6] : memref<1xf32, #tpu.memory_space<smem>>
    %12 = vector.broadcast %11 : f32 to vector<8x512xf32>
    %13 = arith.addf %10, %12 : vector<8x512xf32>
    %c0_7 = arith.constant 0 : index
    %c0_8 = arith.constant 0 : index
    %14 = vector.load %arg4[%c0_7, %c0_8] : memref<8x512xf32, #tpu.memory_space<vmem>>, vector<8x512xf32>
    tpu.vector_store %arg4[%c0_7, %c0_8], %13 {strides = array<i32>} : memref<8x512xf32, #tpu.memory_space<vmem>>, vector<8x512xf32>,
    return
  }
  func.func @transform_0(%arg0: i32) -> (i32, i32, i32) {
    %c0_i32 = arith.constant 0 : i32
    %c0_i32_0 = arith.constant 0 : i32
    %c0_i32_1 = arith.constant 0 : i32
    return %c0_i32, %arg0, %c0_i32_0 : i32, i32, i32
  }
  func.func @transform_1(%arg0: i32) -> i32 {
    %c0_i32 = arith.constant 0 : i32
    %c0_i32_0 = arith.constant 0 : i32
    return %c0_i32 : i32
  }
  func.func @transform_2(%arg0: i32) -> i32 {
    %c0_i32 = arith.constant 0 : i32
    %c0_i32_0 = arith.constant 0 : i32
    return %c0_i32 : i32
  }
  func.func @transform_3(%arg0: i32) -> (i32, i32) {
    %c0_i32 = arith.constant 0 : i32
    %c0_i32_0 = arith.constant 0 : i32
    return %arg0, %c0_i32 : i32, i32
  }
}

</mosaic_0001>

<bundles_post_ra>
// kernel: tpu_custom_call.1
= control target key start
LH: loop header
LB: loop body
LE: loop exit
PB: predicated region body
PF: predicated region fallthrough
CT: control target
= control target key end

     0   :  { %9 = vsyncpa [#allocation4], 0  ;;  %s207_s0 = inlined_call_operand.hbm [shape: f32[2,8,512], index: 0, kind: input, shape index: {}]   ;;  %s208_s1 = inlined_call_operand.vmem [shape: f32[2], index: 1, kind: input, shape index: {}]   ;;  %s209_s2 = inlined_call_operand.<no memory space> [shape: f32[1], index: 2, kind: input, shape index: {}]   ;;  %s210_s3 = inlined_call_operand.hbm [shape: f32[8,512], index: 3, kind: output, shape index: {}]  }
   0x1   :  { %10 = vsyncpa [#allocation6], 0 }
   0x2   :  { %11 = vsyncpa [#allocation5], 0  ;;  %s16_s14 = sshll.u32 %s207_s0, 4  ;;  %s170_s15 = smov [#allocation3]   ;;  %s17_s14 = int_to_ptr.hbm [resolvable:$true] %s16_s14 }
   0x3   :  { %s18_s16 = sshll.u32 %s170_s15, 4  ;;  %s30_s19 = sshll.u32 %s208_s1, 4  ;;  %s19_s16 = int_to_ptr.vmem [resolvable:$true] %s18_s16  ;;  %s31_s19 = int_to_ptr.vmem [resolvable:$true] %s30_s19 }
   0x4   :  { %s171_s20 = smov 512   ;;  %s172_s21 = smov 32  }
   0x5   :  { %24 = dma.hbm_to_vmem [thread:$0]  %s17_s14, 1024, %s19_s16, [#allocation4], %s171_s20, %s171_s20, %s172_s21  }
   0x6   :  { %s173_s22 = smov [#allocation7]  }
   0x7   :  { %33 = dma.vmem_to_smem %s31_s19, 16, %s173_s22, [#allocation6]  }
   0x8   :  { %164 = dma.done.wait [#allocation4], 1024  }
   0x9   :  { %165 = vsyncadd [#allocation4], 4294966272 }
   0xa   :  { %166 = dma.done.wait [#allocation6], 16  }
   0xb   :  { %167 = vsyncadd [#allocation6], 4294967280 }
   0xc   :  { %44 = sfence }
   0xd   :  { %s49_s0 = sld [smem:[#allocation7]]  ;;  %v45_v0 = vld [vmem:[#allocation3] sm:$0xff]  ;;  %v46_v2 = vld [vmem:[#allocation3 + $0x8] sm:$0xff]  ;;  %v47_v3 = vld [vmem:[#allocation3 + $0x10] sm:$0xff]  ;;  %v71_v17 = vstv %s209_s2  ;;  %s174_s25 = smov [#allocation8]  }
   0xe   :  { %s98_s23 = sld [smem:[#allocation7 + $0x1]]  ;;  %v56_v1 = vld [vmem:[#allocation3 + $0x20] sm:$0xff]  ;;  %v57_v4 = vld [vmem:[#allocation3 + $0x28] sm:$0xff]  ;;  %v58_v5 = vld [vmem:[#allocation3 + $0x30] sm:$0xff]  ;;  %s85_s26 = sshll.u32 %s174_s25, 4  ;;  %s86_s26 = int_to_ptr.vmem [resolvable:$true] %s85_s26 }
   0xf   :  { %v48_v6 = vld [vmem:[#allocation3 + $0x18] sm:$0xff]  ;;  %s87_s29 = sshll.u32 %s210_s3, 4  ;;  %s88_s29 = int_to_ptr.hbm [resolvable:$true] %s87_s29 }
  0x10   :  { %v59_v8 = vld [vmem:[#allocation3 + $0x38] sm:$0xff] }
  0x13   :  { %v50_v7 = vstv %s49_s0 }
  0x14   :  { %v51_v9 = vmul.f32 %v50_v7, %v45_v0  ;;  %v61_v10 = vstv %s98_s23  ;;  %v52_v11 = vmul.f32 %v50_v7, %v46_v2  ;;  %v53_v12 = vmul.f32 %v50_v7, %v47_v3 }
  0x15   :  { %v62_v13 = vmul.f32 %v61_v10, %v56_v1  ;;  %v63_v14 = vmul.f32 %v61_v10, %v57_v4  ;;  %v64_v15 = vmul.f32 %v61_v10, %v58_v5  ;;  %v54_v16 = vmul.f32 %v50_v7, %v48_v6 }
  0x16   :  { %v65_v18 = vmul.f32 %v61_v10, %v59_v8 }
  0x17   :  { %v66_v19 = vadd.f32 %v62_v13, %v51_v9  ;;  %v67_v20 = vadd.f32 %v63_v14, %v52_v11  ;;  %v68_v21 = vadd.f32 %v64_v15, %v53_v12 }
  0x18   :  { %v69_v22 = vadd.f32 %v65_v18, %v54_v16 }
  0x19   :  { %v72_v23 = vadd.f32 %v71_v17, %v66_v19  ;;  %v73_v24 = vadd.f32 %v71_v17, %v67_v20  ;;  %v74_v25 = vadd.f32 %v71_v17, %v68_v21 }
  0x1a   :  { %v75_v26 = vadd.f32 %v71_v17, %v69_v22 }
  0x1b   :  { %76 = vst [vmem:[#allocation8] sm:$0xff] %v72_v23 }
  0x1c   :  { %77 = vst [vmem:[#allocation8 + $0x8] sm:$0xff] %v73_v24 }
  0x1d   :  { %78 = vst [vmem:[#allocation8 + $0x10] sm:$0xff] %v74_v25 }
  0x1e   :  { %79 = vst [vmem:[#allocation8 + $0x18] sm:$0xff] %v75_v26 }
  0x1f   :  { %90 = dma.vmem_to_hbm [thread:$0]  %s86_s26, 512, %s88_s29, [#allocation5]  }
  0x20   :  { %168 = dma.done.wait [#allocation5], 512  }
  0x21   :  { %169 = vsyncadd [#allocation5], 4294966784 }
  0x22   :  { %95 = vsyncpa [#allocation4], 1 }
  0x23   :  { %96 = vsyncpa [#allocation5], 1 }
  0x24   :  { %97 = vsyncpa [#allocation6], 1 }

</bundles_post_ra>
